<compile_context>
chip_gen: v6e
topology: v6e:2x2x1
jax: 0.10.0
libtpu: 0.0.40
codegen_flags: <defaults>
</compile_context>

<pallas_src>
import jax
import jax.numpy as jnp
from jax.experimental import pallas as pl
from jax.experimental.pallas import tpu as pltpu

_LANE = 128
# Tensors with fewer elements than this (or ragged counts no 128-multiple
# divides) skip the kernel: jnp.reshape is metadata-only, so the launch +
# glue latency would dominate.  Kept low (one f32 vreg worth) so the demo
# below still exercises the kernel; production callers can raise it.
_MIN_KERNEL_ELEMS = _LANE * 8


def _copy_kernel(x_ref, o_ref):
    # Identity copy of the current tile — this *is* the reshape's data path.
    o_ref[...] = x_ref[...]


def _resolve_shape(shape, total):
    """Resolve a single -1 entry like torch.reshape does."""
    shape = tuple(int(s) for s in shape)
    if -1 in shape:
        neg_idx = shape.index(-1)
        known = 1
        for i, s in enumerate(shape):
            if i != neg_idx:
                known *= s
        assert known != 0 and total % known == 0, "cannot infer -1 dimension"
        shape = shape[:neg_idx] + (total // known,) + shape[neg_idx + 1:]
    prod = 1
    for s in shape:
        prod *= s
    assert prod == total, f"reshape size mismatch: {shape} vs {total} elems"
    return shape


def _target_tile_bytes():
    """Generation-aware tile size for the streaming copy."""
    try:
        kind = jax.devices()[0].device_kind.lower()
    except Exception:
        kind = ""
    if "v7" in kind or "v6" in kind:
        # v6e/v7x: 4 MiB tiles -> ~16 MiB double-buffered (in+out) footprint,
        # inside the 32 MiB default scoped VMEM.  Never size tiles assuming
        # 128 MiB: v7x only has 64 MiB physical VMEM per TensorCore.
        return 4 * 1024 * 1024
    # v5e / unknown: 2 MiB keeps the 4x-tile footprint under the 16 MiB
    # default scoped VMEM; at ~0.82 TB/s step overhead is already hidden.
    return 2 * 1024 * 1024


def _choose_layout(total, dtype):
    """Return (rows, cols, block_rows) for the flat lane-dense copy, or None
    when the metadata-only jnp.reshape fast path should be used instead."""
    if total < _MIN_KERNEL_ELEMS:
        return None

    itemsize = jnp.dtype(dtype).itemsize
    # Sublane packing: 8 for 32-bit, 16 for bf16/f16, 32 for int8/fp8.
    sublane = max(8, 32 // itemsize)

    # Widest power-of-two multiple of 128 that exactly divides the element
    # count -> no padding, every tile lane-dense & unmasked along lanes.
    # Ragged counts (no such width) fall back to the free metadata reshape
    # rather than paying an extra pad+slice HBM pass on a mem-bound memcpy.
    cols = None
    for c in (2048, 1024, 512, 256, 128):
        if total % c == 0:
            cols = c
            break
    if cols is None:
        return None

    rows = total // cols

    # MiB-scale, dtype/generation-aware row tile to amortize the ~0.35 us
    # per-grid-step overhead while keeping double-buffered VMEM in bounds.
    tile_bytes = _target_tile_bytes()
    target_rows = max(sublane, (tile_bytes // (cols * itemsize)) // sublane * sublane)

    if rows > target_rows:
        block_rows = target_rows
    elif rows >= 2 * sublane:
        # Mid-size tensor: split into (at least) two blocks so
        # dimension_semantics=("parallel",) can shard across both
        # TensorCores on v7x instead of leaving one idle.
        block_rows = ((pl.cdiv(rows, 2) + sublane - 1) // sublane) * sublane
    else:
        block_rows = rows  # single full-extent block (always legal)
    return rows, cols, block_rows


class Reshape:
    """JAX/Pallas counterpart of the PyTorch Reshape module."""

    def __init__(self, *args):
        self.shape = args

    def __call__(self, x):
        total = int(x.size)
        target = _resolve_shape(self.shape, total)
        if total == 0:
            return jnp.reshape(x, target)

        layout = _choose_layout(total, x.dtype)
        if layout is None:
            # Tiny or ragged element count: a contiguous reshape is pure
            # metadata in XLA, so skip the kernel (pure latency win).
            return jnp.reshape(x, target)

        rows, cols, block_rows = layout
        xf = jnp.reshape(x, (rows, cols))
        # cdiv grid: a partial edge block (rows % block_rows != 0) is masked
        # by Pallas on writeback — no pre-pad / post-slice HBM passes needed.
        grid = (pl.cdiv(rows, block_rows),)
        itemsize = jnp.dtype(x.dtype).itemsize

        out2d = pl.pallas_call(
            _copy_kernel,
            out_shape=jax.ShapeDtypeStruct((rows, cols), x.dtype),
            grid=grid,
            in_specs=[pl.BlockSpec((block_rows, cols), lambda i: (i, 0))],
            out_specs=pl.BlockSpec((block_rows, cols), lambda i: (i, 0)),
            compiler_params=pltpu.CompilerParams(
                # Row axis is fully independent -> shards across both TCs on
                # v7x; measured no-op on single-TC v5e/v6e, so it costs nothing.
                dimension_semantics=("parallel",),
            ),
            cost_estimate=pl.CostEstimate(
                flops=0, transcendentals=0,
                bytes_accessed=2 * total * itemsize,
            ),
        )(xf)

        # Metadata-only view to the requested target shape.
        return jnp.reshape(out2d, target)


if __name__ == "__main__":
    key = jax.random.PRNGKey(0)

    # Case 1: typical Reshape(B, -1) on an NCHW-like activation — kernel path
    # with a single lane-dense (1, 2048) block.
    x = jax.random.normal(key, (2, 4, 16, 16), dtype=jnp.float32)
    y = Reshape(2, -1)(x)
    jax.block_until_ready(y)
    assert y.shape == (2, 1024), y.shape
    assert y.dtype == x.dtype
    assert bool(jnp.array_equal(y, jnp.reshape(x, (2, -1)))), "mismatch (case 1)"

    # Case 2: ragged element count (105 elems) — metadata-only fast path.
    x2 = jax.random.normal(jax.random.PRNGKey(1), (3, 5, 7), dtype=jnp.float32)
    y2 = Reshape(5, -1)(x2)
    jax.block_until_ready(y2)
    assert y2.shape == (5, 21), y2.shape
    assert bool(jnp.array_equal(y2, jnp.reshape(x2, (5, -1)))), "mismatch (case 2)"

    # Case 3: multi-block grid with a masked partial edge block
    # (rows=125, cols=1024, block_rows=64 -> grid=(2,), edge block 61 rows).
    x3 = jax.random.normal(jax.random.PRNGKey(2), (20, 50, 128), dtype=jnp.float32)
    y3 = Reshape(-1, 256)(x3)
    jax.block_until_ready(y3)
    assert y3.shape == (500, 256), y3.shape
    assert bool(jnp.array_equal(y3, jnp.reshape(x3, (-1, 256)))), "mismatch (case 3)"

    print("KERNEL_OK")
</pallas_src>

<mosaic_0001>
module attributes {stable_mosaic.version = 11 : i64} {
  func.func @_copy_kernel(%arg0: i32, %arg1: memref<1x2048xf32, #tpu.memory_space<vmem>>, %arg2: memref<1x2048xf32, #tpu.memory_space<vmem>>) attributes {dimension_semantics = [#tpu.dimension_semantics<parallel>], iteration_bounds = array<i64: 1>, scalar_prefetch = 0 : i64, scratch_operands = 0 : i64, tpu.core_type = #tpu.core_type<tc>, window_params = [{transform_indices = @transform_0, window_bounds = array<i64: 1, 2048>}, {transform_indices = @transform_1, window_bounds = array<i64: 1, 2048>}]} {
    %c0 = arith.constant 0 : index
    %c0_0 = arith.constant 0 : index
    %0 = vector.load %arg1[%c0, %c0_0] : memref<1x2048xf32, #tpu.memory_space<vmem>>, vector<1x2048xf32>
    %c0_1 = arith.constant 0 : index
    %c0_2 = arith.constant 0 : index
    %1 = vector.load %arg2[%c0_1, %c0_2] : memref<1x2048xf32, #tpu.memory_space<vmem>>, vector<1x2048xf32>
    tpu.vector_store %arg2[%c0_1, %c0_2], %0 {strides = array<i32>} : memref<1x2048xf32, #tpu.memory_space<vmem>>, vector<1x2048xf32>,
    return
  }
  func.func @transform_0(%arg0: i32) -> (i32, i32) {
    %c0_i32 = arith.constant 0 : i32
    %c0_i32_0 = arith.constant 0 : i32
    return %arg0, %c0_i32 : i32, i32
  }
  func.func @transform_1(%arg0: i32) -> (i32, i32) {
    %c0_i32 = arith.constant 0 : i32
    %c0_i32_0 = arith.constant 0 : i32
    return %arg0, %c0_i32 : i32, i32
  }
}

</mosaic_0001>

<bundles_post_ra>
// kernel: tpu_custom_call.1
= control target key start
LH: loop header
LB: loop body
LE: loop exit
PB: predicated region body
PF: predicated region fallthrough
CT: control target
= control target key end

     0   :  { %6 = vsyncpa [#allocation3], 0  ;;  %s104_s0 = inlined_call_operand.hbm [shape: f32[1,2048], index: 0, kind: input, shape index: {}]   ;;  %s105_s1 = inlined_call_operand.hbm [shape: f32[1,2048], index: 1, kind: output, shape index: {}]  }
   0x1   :  { %7 = vsyncpa [#allocation4], 0  ;;  %s86_s6 = smov [#allocation2]  }
   0x2   :  { %s14_s7 = sshll.u32 %s86_s6, 4  ;;  %s15_s7 = int_to_ptr.vmem [resolvable:$true] %s14_s7 }
   0x3   :  { %s50_s8 = scalar_lea.vmem %s15_s7, 256  ;;  %p55_p1 = scmp.lt.s32.totalorder %s15_s7, %s15_s7 }
   0x4   :  { %p51_p0 = scmp.ne.s32.totalorder %s15_s7, %s50_s8  ;;  %p56_p2 = scmp.lt.s32.totalorder %s50_s8, %s50_s8 }
   0x6   :  { %p57_p3 = por %p56_p2, %p55_p1 }
   0x8   :  { %p58_p4 = pnand %p57_p3, %p51_p0 }
   0xa   :  { %61 = shalt.err (!%p58_p4)
}
   0xb   :  { %17 = dma.hbm_to_vmem [thread:$0]  %s104_s0, 256, %s15_s7, [#allocation3]  }
   0xc   :  { %82 = dma.done.wait [#allocation3], 256  }
   0xd   :  { %83 = vsyncadd [#allocation3], 4294967040  ;;  %s87_s11 = smov [#allocation5]   ;;  %v21_v0 = vld [vmem:[#allocation2] sm:$0xff]  ;;  %v22_v1 = vld [vmem:[#allocation2 + $0x8] sm:$0xff] }
   0xe   :  { %s31_s12 = sshll.u32 %s87_s11, 4  ;;  %23 = vst [vmem:[#allocation5] sm:$0xff] %v21_v0  ;;  %24 = vst [vmem:[#allocation5 + $0x8] sm:$0xff] %v22_v1  ;;  %s32_s12 = int_to_ptr.vmem [resolvable:$true] %s31_s12 }
   0xf   :  { %s62_s13 = scalar_lea.vmem %s32_s12, 256  ;;  %p67_p6 = scmp.lt.s32.totalorder %s32_s12, %s32_s12 }
  0x10   :  { %p63_p5 = scmp.ne.s32.totalorder %s32_s12, %s62_s13  ;;  %p68_p7 = scmp.lt.s32.totalorder %s62_s13, %s62_s13 }
  0x12   :  { %p69_p8 = por %p68_p7, %p67_p6 }
  0x14   :  { %p70_p9 = pnand %p69_p8, %p63_p5 }
  0x16   :  { %73 = shalt.err (!%p70_p9)
}
  0x17   :  { %34 = dma.vmem_to_hbm [thread:$0]  %s32_s12, 256, %s105_s1, [#allocation4]  }
  0x18   :  { %84 = dma.done.wait [#allocation4], 256  }
  0x19   :  { %85 = vsyncadd [#allocation4], 4294967040 }
  0x1a   :  { %38 = vsyncpa [#allocation3], 1 }
  0x1b   :  { %39 = vsyncpa [#allocation4], 1 }

</bundles_post_ra>
